<compile_context>
chip_gen: v5e
topology: v5e:2x2
jax: 0.10.0
libtpu: 0.0.40
codegen_flags: <defaults>
</compile_context>

<pallas_src>
import jax
import jax.numpy as jnp
from jax.experimental import pallas as pl
from jax.experimental.pallas import tpu as pltpu

_LANE = 128
_TARGET_STEP_BYTES = 4 * 1024 * 1024   # aim for >= ~4 MiB of HBM traffic / grid step


def _round_up(x, m):
    return ((x + m - 1) // m) * m


def _vmem_capacity_bytes():
    """Physical VMEM per TensorCore (v5e/v6e: 128 MiB, v7x: 64 MiB)."""
    try:
        return int(pltpu.get_tpu_info().vmem_capacity_bytes)
    except Exception:
        return 64 * 1024 * 1024   # conservative fallback (v7x-sized)


def _ntfm3d_kernel(pts_ref, msk_ref, w_ref, out_ref):
    # pts_ref: (1, 3, T)  msk_ref: (1, K, T)  w_ref: (1, 12, K)  out_ref: (1, 3, T)
    p = pts_ref[0].astype(jnp.float32)    # (3, T)
    m = msk_ref[0].astype(jnp.float32)    # (K, T)
    w = w_ref[0].astype(jnp.float32)      # (12, K); row j*3+c = transforms[k, c, j]

    # A[j*3+c, :] = sum_k transforms[k, c, j] * m[k, :]
    # MXU contraction over K; moving operand is the (K, T) mask block (no Q buffer).
    a = jnp.dot(
        w, m,
        preferred_element_type=jnp.float32,
        precision=jax.lax.Precision.HIGHEST,
    )  # (12, T)

    # out[c] = p0 * A[c] + p1 * A[3+c] + p2 * A[6+c] + A[9+c]   (per-lane VPU finish)
    out = (
        a[0:3, :] * p[0:1, :]
        + a[3:6, :] * p[1:2, :]
        + a[6:9, :] * p[2:3, :]
        + a[9:12, :]
    )
    out_ref[0] = out.astype(out_ref.dtype)


def _pick_tile_n(N, B, K, itemsize, vmem_limit_bytes):
    """Pixels per grid step: big enough to hide per-step overhead, small enough for VMEM."""
    # HBM bytes streamed per pixel per grid step (points + masks + output blocks).
    bytes_per_px = (3 + K + 3) * itemsize
    target_px = pl.cdiv(_TARGET_STEP_BYTES, bytes_per_px)

    # VMEM per pixel: double-buffered in/out blocks + the (12, T) f32 intermediate.
    vmem_per_px = 2 * bytes_per_px + 12 * 4
    vmem_cap_px = max(_LANE, (vmem_limit_bytes // 2) // vmem_per_px)

    tile = min(target_px, vmem_cap_px, N)
    # Megacore (v7x has 2 TensorCores): make sure B * grid_n >= 2 when possible.
    if B == 1 and N > _LANE:
        tile = min(tile, pl.cdiv(N, 2))
    return max(_LANE, _round_up(tile, _LANE))


def ntfm3d(points, masks, transforms):
    """points (B,3,H,W), masks (B,K,H,W), transforms (B,K,3,4) -> (B,3,H,W)."""
    B, C, H, W_img = points.shape
    assert C == 3
    K = masks.shape[1]
    assert masks.shape == (B, K, H, W_img)
    assert transforms.shape == (B, K, 3, 4)

    N = H * W_img
    itemsize = jnp.dtype(points.dtype).itemsize

    vmem_cap = _vmem_capacity_bytes()
    # Raise v5e's small default scoped limit; stay at/below defaults on v6e/v7x.
    vmem_limit = int(min(vmem_cap // 2, 64 * 1024 * 1024))

    tile_n = _pick_tile_n(N, B, K, itemsize, vmem_limit)
    grid_n = pl.cdiv(N, tile_n)

    # Free reshapes (trailing-dim collapse); no pad / slice copies of the big arrays.
    pts = points.reshape(B, 3, N)
    msk = masks.reshape(B, K, N)
    # W[b, j*3 + c, k] = transforms[b, k, c, j]   (rows 9..11 hold the translation)
    w = jnp.transpose(transforms, (0, 3, 2, 1)).reshape(B, 12, K)

    cost = pl.CostEstimate(
        flops=int((2 * 12 * K + 18) * B * N),
        transcendentals=0,
        bytes_accessed=int((3 + K + 3) * B * N * itemsize + B * 12 * K * 4),
    )

    out = pl.pallas_call(
        _ntfm3d_kernel,
        out_shape=jax.ShapeDtypeStruct((B, 3, N), points.dtype),
        grid_spec=pltpu.PrefetchScalarGridSpec(
            num_scalar_prefetch=0,
            grid=(B, grid_n),
            in_specs=[
                pl.BlockSpec((1, 3, tile_n), lambda b, n: (b, 0, n)),
                pl.BlockSpec((1, K, tile_n), lambda b, n: (b, 0, n)),
                # Per-batch W: block index constant across the inner axis
                # -> fetched once per batch, resident while pixel tiles stream.
                pl.BlockSpec((1, 12, K), lambda b, n: (b, 0, 0)),
            ],
            out_specs=pl.BlockSpec((1, 3, tile_n), lambda b, n: (b, 0, n)),
        ),
        compiler_params=pltpu.CompilerParams(
            dimension_semantics=("parallel", "parallel"),
            vmem_limit_bytes=vmem_limit,
        ),
        cost_estimate=cost,
    )(pts, msk, w)

    return out.reshape(B, 3, H, W_img)


def ntfm3d_ref(points, masks, transforms):
    B, C, H, W_img = points.shape
    K = masks.shape[1]
    p = points.reshape(B, 3, H * W_img)
    m = masks.reshape(B, K, H * W_img)
    R = transforms[..., :3]              # (B, K, 3, 3)
    t = transforms[..., 3]               # (B, K, 3)
    tp = jnp.einsum('bkcj,bjn->bkcn', R, p, precision='highest') + t[..., None]
    out = jnp.einsum('bkn,bkcn->bcn', m, tp, precision='highest')
    return out.reshape(B, 3, H, W_img)


if __name__ == "__main__":
    key = jax.random.PRNGKey(0)

    def run_case(B, K, H, W, tag):
        k1, k2, k3 = jax.random.split(jax.random.fold_in(key, 1000 * B + H * W + K), 3)
        points = jax.random.normal(k1, (B, 3, H, W), dtype=jnp.float32)
        # masks: softmax over the SE3 axis, as typically produced upstream of NTfm3D
        mask_logits = jax.random.normal(k2, (B, K, H, W), dtype=jnp.float32)
        masks = jax.nn.softmax(mask_logits, axis=1)
        transforms = jax.random.normal(k3, (B, K, 3, 4), dtype=jnp.float32) * 0.1

        out = jax.block_until_ready(ntfm3d(points, masks, transforms))
        ref = jax.block_until_ready(ntfm3d_ref(points, masks, transforms))
        assert out.shape == (B, 3, H, W), tag
        assert jnp.allclose(out, ref, atol=2e-5, rtol=2e-5), tag

    run_case(2, 8, 16, 16, "aligned")     # N = 256 (multiple of 128)
    run_case(2, 8, 20, 24, "ragged")      # N = 480 (masked ragged edge block)
    run_case(1, 4, 48, 40, "megacore")    # B = 1 -> tile capped at ~N/2 (2 grid steps)
    print("KERNEL_OK")
</pallas_src>

<mosaic_0001>
module attributes {stable_mosaic.version = 11 : i64} {
  func.func @_ntfm3d_kernel(%arg0: i32, %arg1: i32, %arg2: memref<1x3x256xf32, #tpu.memory_space<vmem>>, %arg3: memref<1x8x256xf32, #tpu.memory_space<vmem>>, %arg4: memref<1x12x8xf32, #tpu.memory_space<vmem>>, %arg5: memref<1x3x256xf32, #tpu.memory_space<vmem>>) attributes {dimension_semantics = [#tpu.dimension_semantics<parallel>, #tpu.dimension_semantics<parallel>], iteration_bounds = array<i64: 2, 1>, scalar_prefetch = 0 : i64, scratch_operands = 0 : i64, tpu.core_type = #tpu.core_type<tc>, window_params = [{transform_indices = @transform_0, window_bounds = array<i64: 1, 3, 256>}, {transform_indices = @transform_1, window_bounds = array<i64: 1, 8, 256>}, {transform_indices = @transform_2, window_bounds = array<i64: 1, 12, 8>}, {transform_indices = @transform_3, window_bounds = array<i64: 1, 3, 256>}]} {
    %c0 = arith.constant 0 : index
    %c0_0 = arith.constant 0 : index
    %c0_1 = arith.constant 0 : index
    %0 = vector.load %arg2[%c0, %c0_0, %c0_1] : memref<1x3x256xf32, #tpu.memory_space<vmem>>, vector<1x3x256xf32>
    %1 = vector.shape_cast %0 : vector<1x3x256xf32> to vector<3x256xf32>
    %c0_2 = arith.constant 0 : index
    %c0_3 = arith.constant 0 : index
    %c0_4 = arith.constant 0 : index
    %2 = vector.load %arg3[%c0_2, %c0_3, %c0_4] : memref<1x8x256xf32, #tpu.memory_space<vmem>>, vector<1x8x256xf32>
    %3 = vector.shape_cast %2 : vector<1x8x256xf32> to vector<8x256xf32>
    %c0_5 = arith.constant 0 : index
    %c0_6 = arith.constant 0 : index
    %c0_7 = arith.constant 0 : index
    %4 = vector.load %arg4[%c0_5, %c0_6, %c0_7] : memref<1x12x8xf32, #tpu.memory_space<vmem>>, vector<1x12x8xf32>
    %5 = vector.shape_cast %4 : vector<1x12x8xf32> to vector<12x8xf32>
    %cst = arith.constant dense<0.000000e+00> : vector<12x256xf32>
    %6 = tpu.matmul %5, %3, %cst {dimension_numbers = #tpu.dot_dimension_numbers<[1], [0], [0], [1], [0, 0, 1, 1], [], []>, precision = #tpu.contract_precision<fp32>} : vector<12x8xf32>, vector<8x256xf32>, vector<12x256xf32> -> vector<12x256xf32>
    %7 = vector.extract_strided_slice %6 {offsets = [0, 0], sizes = [3, 256], strides = [1, 1]} : vector<12x256xf32> to vector<3x256xf32>
    %8 = vector.extract_strided_slice %1 {offsets = [0, 0], sizes = [1, 256], strides = [1, 1]} : vector<3x256xf32> to vector<1x256xf32>
    %9 = vector.broadcast %8 : vector<1x256xf32> to vector<3x256xf32>
    %10 = arith.mulf %7, %9 : vector<3x256xf32>
    %11 = vector.extract_strided_slice %6 {offsets = [3, 0], sizes = [3, 256], strides = [1, 1]} : vector<12x256xf32> to vector<3x256xf32>
    %12 = vector.extract_strided_slice %1 {offsets = [1, 0], sizes = [1, 256], strides = [1, 1]} : vector<3x256xf32> to vector<1x256xf32>
    %13 = vector.broadcast %12 : vector<1x256xf32> to vector<3x256xf32>
    %14 = arith.mulf %11, %13 : vector<3x256xf32>
    %15 = arith.addf %10, %14 : vector<3x256xf32>
    %16 = vector.extract_strided_slice %6 {offsets = [6, 0], sizes = [3, 256], strides = [1, 1]} : vector<12x256xf32> to vector<3x256xf32>
    %17 = vector.extract_strided_slice %1 {offsets = [2, 0], sizes = [1, 256], strides = [1, 1]} : vector<3x256xf32> to vector<1x256xf32>
    %18 = vector.broadcast %17 : vector<1x256xf32> to vector<3x256xf32>
    %19 = arith.mulf %16, %18 : vector<3x256xf32>
    %20 = arith.addf %15, %19 : vector<3x256xf32>
    %21 = vector.extract_strided_slice %6 {offsets = [9, 0], sizes = [3, 256], strides = [1, 1]} : vector<12x256xf32> to vector<3x256xf32>
    %22 = arith.addf %20, %21 : vector<3x256xf32>
    %c0_8 = arith.constant 0 : index
    %c0_9 = arith.constant 0 : index
    %c0_10 = arith.constant 0 : index
    %23 = vector.load %arg5[%c0_8, %c0_9, %c0_10] : memref<1x3x256xf32, #tpu.memory_space<vmem>>, vector<1x3x256xf32>
    %24 = vector.shape_cast %23 : vector<1x3x256xf32> to vector<3x256xf32>
    %25 = vector.shape_cast %22 : vector<3x256xf32> to vector<1x3x256xf32>
    tpu.vector_store %arg5[%c0_8, %c0_9, %c0_10], %25 {strides = array<i32>} : memref<1x3x256xf32, #tpu.memory_space<vmem>>, vector<1x3x256xf32>,
    return
  }
  func.func @transform_0(%arg0: i32, %arg1: i32) -> (i32, i32, i32) {
    %c0_i32 = arith.constant 0 : i32
    %c0_i32_0 = arith.constant 0 : i32
    return %arg0, %c0_i32, %arg1 : i32, i32, i32
  }
  func.func @transform_1(%arg0: i32, %arg1: i32) -> (i32, i32, i32) {
    %c0_i32 = arith.constant 0 : i32
    %c0_i32_0 = arith.constant 0 : i32
    return %arg0, %c0_i32, %arg1 : i32, i32, i32
  }
  func.func @transform_2(%arg0: i32, %arg1: i32) -> (i32, i32, i32) {
    %c0_i32 = arith.constant 0 : i32
    %c0_i32_0 = arith.constant 0 : i32
    %c0_i32_1 = arith.constant 0 : i32
    return %arg0, %c0_i32, %c0_i32_0 : i32, i32, i32
  }
  func.func @transform_3(%arg0: i32, %arg1: i32) -> (i32, i32, i32) {
    %c0_i32 = arith.constant 0 : i32
    %c0_i32_0 = arith.constant 0 : i32
    return %arg0, %c0_i32, %arg1 : i32, i32, i32
  }
}

</mosaic_0001>

<bundles_post_ra>
// kernel: tpu_custom_call.1
= control target key start
LH: loop header
LB: loop body
LE: loop exit
PB: predicated region body
PF: predicated region fallthrough
CT: control target
= control target key end

     0   :  { %s901_s12 = smov 0   ;;  %s903_s13 = smov 0   ;;  %s948_s0 = inlined_call_operand.vmem [shape: f32[2,3,256], index: 0, kind: input, shape index: {}]   ;;  %s949_s1 = inlined_call_operand.vmem [shape: f32[2,8,256], index: 1, kind: input, shape index: {}]   ;;  %s950_s2 = inlined_call_operand.vmem [shape: f32[2,12,8], index: 2, kind: input, shape index: {}]   ;;  %s951_s3 = inlined_call_operand.vmem [shape: f32[2,3,256], index: 3, kind: output, shape index: {}]  }
   0x1   :  { %s905_s14 = smov 0  }
   0x2 LB: > { %s25_s15 = sadd.s32 1, %s875_s13  ;;  %p818_p0 = scmp.ge.s32.totalorder %s879_s14, 1  ;;  %s879_s14 = sphi %s905_s14, %s13_s14   ;;  %s875_s13 = sphi %s903_s13, %s953_s13   ;;  %s871_s12 = sphi %s901_s12, %s952_s12  }
   0x3   : > { %p27_p1 = scmp.ge.s32.totalorder %s25_s15, 2  ;;  %p185_p2 = scmp.lt.s32.totalorder %s879_s14, 3 }
   0x5   : > { %s955_s15 = smov (%p27_p1, %s25_s15), 0  ;;  %p186_p3 = pnand %p818_p0, %p185_p2 }
   0x6   : > { %p232_p4 = scmp.lt.s32.totalorder (!%p186_p3), %s871_s12, 1 }
   0x7   : > { %189 = sbr.rel (%p186_p3) target bundleno = 215 (0xd7), region = 32 }
   0xc   : > { %s957_s12 = smov (!%p232_p4, %s871_s12), 1  ;;  %vm271_vm0 = vcmask 64512   ;;  %vm671_vm1 = vcmask 1041408   ;;  %vm693_vm2 = vcmask 1043456  }
   0xd   : > { %s830_s16 = sshll.u32 %s957_s12, 4  ;;  %s829_s23 = sshll.u32 %s957_s12, 3 }
   0xe   : > { %s249_s19 = scalar_lea.vmem %s949_s1, %s830_s16  ;;  %s255_s22 = scalar_lea.vmem %s950_s2, %s830_s16 }
   0xf   : > { %v267_v0 = vld [vmem:[%s249_s19] sm:$0xff]  ;;  %v268_v1 = vld [vmem:[%s249_s19 + $0x8] sm:$0xff]  ;;  %s239_s26 = scalar_lea.vmem %s948_s0, %s829_s23  ;;  %s264_s29 = scalar_lea.vmem %s951_s3, %s829_s23 }
  0x10   : > { %v269_v2 = vld [vmem:[%s255_s22] sm:$0xff]  ;;  %v270_v3 = vld [vmem:[%s255_s22 + $0x8] sm:$0xf]  ;;  %v293_v4 = vand.u32 4294901760, %v267_v0  ;;  %v470_v5 = vand.u32 4294901760, %v268_v1 }
  0x11   : > { %v273_v6 = vsel %vm271_vm0, %v269_v2, 0  ;;  %v276_v7 = vsel %vm271_vm0, %v270_v3, 0  ;;  %v266_v50 = vld [vmem:[%s239_s26] sm:$0x77] }
  0x12   : > { %v328_v8 = vsub.f32 %v267_v0, %v293_v4  ;;  %v295_v9 = vand.u32 4294901760, %v273_v6  ;;  %387 = vmatpush.msra.mxu3 %v293_v4  ;;  %294 = vmatpush.msra.mxu0 %v293_v4  ;;  %v505_v10 = vsub.f32 %v268_v1, %v470_v5  ;;  %v303_v11 = vand.u32 4294901760, %v276_v7 }
  0x13   : > { %v641_v58 = vperm.slane %v266_v50, 1  ;;  %v642_v59 = vperm.slane %v266_v50, 5  ;;  %v657_v60 = vperm.slane %v266_v50, 2  ;;  %v658_v0 = vperm.slane %v266_v50, 6 }
  0x14   : > { %359 = vmatpush.msra.mxu2 %v328_v8  ;;  %v296_v12 = vsub.f32 %v273_v6, %v295_v9  ;;  %v329_v13 = vand.u32 4294901760, %v328_v8  ;;  %v506_v14 = vand.u32 4294901760, %v505_v10  ;;  %v304_v15 = vsub.f32 %v276_v7, %v303_v11 }
  0x15   : > { %v645_v2 = vperm.slane %v641_v58, 1  ;;  %v661_v7 = vperm.slane %v657_v60, 2 }
  0x16   : > { %471 = vmatpush.msrb.mxu2 %v470_v5  ;;  %v297_v16 = vand.u32 4294901760, %v296_v12  ;;  %v330_v17 = vsub.f32 %v328_v8, %v329_v13  ;;  %419 = vmatpush.msrb.mxu0 %v329_v13  ;;  %v507_v18 = vsub.f32 %v505_v10, %v506_v14  ;;  %v305_v22 = vand.u32 4294901760, %v304_v15 }
  0x17   : > { %362 = vmatmul.f32.vlgmr.msra.gmra.mxu2 %v296_v12 }
  0x18   : > { %596 = vmatpush.msra.mxu2 %v506_v14  ;;  %391 = vmatmul.f32.vlgmr.msra.gmra.mxu3 %v297_v16  ;;  %v331_v19 = vand.u32 4294901760, %v330_v17  ;;  %v298_v20 = vsub.f32 %v296_v12, %v297_v16  ;;  %v508_v21 = vand.u32 4294901760, %v507_v18  ;;  %v306_v24 = vsub.f32 %v304_v15, %v305_v22 }
  0x19   : > { %v662_v14 = vperm.slane %v658_v0, 2 }
  0x1a   : > { %332 = vmatpush.msra.mxu1 %v331_v19  ;;  %v299_v23 = vand.u32 4294901760, %v298_v20  ;;  %509 = vmatpush.msrb.mxu3 %v508_v21  ;;  %v307_v25 = vand.u32 4294901760, %v306_v24 }
  0x1b   : > { %334 = vmatmul.f32.vlgmr.msra.gmra.mxu1 %v295_v9 }
  0x1c   : > { %622 = vmatpush.msra.mxu3 %v470_v5  ;;  %300 = vmatmul.f32.vlgmr.msra.gmra.mxu0 %v299_v23 }
  0x1d   : > { %445 = vmatpush.msrb.mxu1 %v293_v4  ;;  %536 = vmatpush.msra.mxu0 %v505_v10  ;;  %v646_v4 = vperm.slane %v642_v59, 1  ;;  %v634_v10 = vperm.slane %v266_v50, 4 }
  0x1f   : > { %564 = vmatpush.msra.mxu1 %v470_v5  ;;  %367 = vmatmul.f32.gmra.mxu2 %v304_v15  ;;  %v638_v21 = vperm.slane %v634_v10, 0 }
  0x20   : > { %397 = vmatmul.f32.gmra.mxu3 %v305_v22 }
  0x23   : > { %338 = vmatmul.f32.gmra.mxu1 %v303_v11 }
  0x24   : > { %308 = vmatmul.f32.gmra.mxu0 %v307_v25 }
  0x27   : > { %477 = vmatmul.f32.vlgmr.msrb.gmra.mxu2 %v299_v23 }
  0x28   : > { %511 = vmatmul.f32.vlgmr.msrb.gmra.mxu3 %v295_v9 }
  0x2b   : > { %447 = vmatmul.f32.vlgmr.msrb.gmra.mxu1 %v295_v9 }
  0x2c   : > { %421 = vmatmul.f32.vlgmr.msrb.gmra.mxu0 %v295_v9 }
  0x2f   : > { %485 = vmatmul.f32.gmra.mxu2 %v307_v25 }
  0x30   : > { %515 = vmatmul.f32.gmra.mxu3 %v303_v11 }
  0x33   : > { %451 = vmatmul.f32.gmra.mxu1 %v303_v11 }
  0x34   : > { %425 = vmatmul.f32.gmra.mxu0 %v303_v11 }
  0x37   : > { %598 = vmatmul.f32.vlgmr.msra.gmra.mxu2 %v295_v9 }
  0x38   : > { %624 = vmatmul.f32.vlgmr.msra.gmra.mxu3 %v295_v9  ;;  %v633_v9 = vperm.slane %v266_v50, 0 }
  0x3a   : > { %v637_v20 = vperm.slane %v633_v9, 0 }
  0x3b   : > { %568 = vmatmul.f32.vlgmr.msra.gmra.mxu1 %v297_v16 }
  0x3c   : > { %539 = vmatmul.f32.vlgmr.msra.gmra.mxu0 %v296_v12 }
  0x3f   : > { %602 = vmatmul.f32.gmra.mxu2 %v303_v11 }
  0x40   : > { %628 = vmatmul.f32.gmra.mxu3 %v303_v11 }
  0x43   : > { %574 = vmatmul.f32.gmra.mxu1 %v305_v22 }
  0x44   : > { %544 = vmatmul.f32.gmra.mxu0 %v304_v15 }
  0x98   : > { %v335_v26 = vpop.f32.mrf.mxu1 }
  0x99   : > { %v301_v27 = vpop.f32.mrf.mxu0 }
  0x9a   : > { %v363_v28 = vpop.f32.mrf.mxu2  ;;  %v336_v42 = vadd.f32 %v335_v26, %v301_v27 }
  0x9b   : > { %v392_v29 = vpop.f32.mrf.mxu3 }
  0x9c   : > { %v364_v45 = vadd.f32 %v363_v28, %v336_v42 }
  0x9e   : > { %v393_v53 = vadd.f32 %v392_v29, %v364_v45 }
  0xa0   : > { %v339_v30 = vpop.f32.mrf.mxu1 }
  0xa1   : > { %v309_v31 = vpop.f32.mrf.mxu0 }
  0xa2   : > { %v368_v32 = vpop.f32.mrf.mxu2  ;;  %v340_v41 = vadd.f32 %v339_v30, %v309_v31 }
  0xa3   : > { %v398_v33 = vpop.f32.mrf.mxu3 }
  0xa4   : > { %v369_v44 = vadd.f32 %v368_v32, %v340_v41 }
  0xa6   : > { %v399_v51 = vadd.f32 %v398_v33, %v369_v44 }
  0xa8   : > { %v448_v34 = vpop.f32.mrf.mxu1 }
  0xa9   : > { %v422_v35 = vpop.f32.mrf.mxu0 }
  0xaa   : > { %v478_v36 = vpop.f32.mrf.mxu2  ;;  %v423_v57 = vadd.f32 %v422_v35, %v393_v53 }
  0xab   : > { %v512_v37 = vpop.f32.mrf.mxu3 }
  0xac   : > { %v513_v46 = vadd.f32 %v512_v37, %v478_v36  ;;  %v449_v1 = vadd.f32 %v448_v34, %v423_v57 }
  0xae   : > { %v647_v15 = vmul.f32 %v645_v2, %v449_v1  ;;  %v663_v18 = vmul.f32 %v661_v7, %v449_v1  ;;  %v639_v29 = vmul.f32 %v637_v20, %v449_v1 }
  0xb0   : > { %v452_v38 = vpop.f32.mrf.mxu1  ;;  %v651_v25 = vrot.slane %v647_v15, 3  ;;  %v672_v27 = vrot.slane %v663_v18, 6 }
  0xb1   : > { %v426_v39 = vpop.f32.mrf.mxu0 }
  0xb2   : > { %v486_v40 = vpop.f32.mrf.mxu2  ;;  %v427_v55 = vadd.f32 %v426_v39, %v399_v51  ;;  %v655_v34 = vadd.f32 %v651_v25, %v639_v29 }
  0xb3   : > { %v516_v43 = vpop.f32.mrf.mxu3 }
  0xb4   : > { %v453_v62 = vadd.f32 %v452_v38, %v427_v55  ;;  %v517_v63 = vadd.f32 %v516_v43, %v486_v40 }
  0xb6   : > { %v665_v12 = vmul.f32 %v661_v7, %v453_v62  ;;  %v684_v40 = vrot.slane %v453_v62, 1 }
  0xb8   : > { %v569_v47 = vpop.f32.mrf.mxu1  ;;  %v673_v22 = vrot.slane %v665_v12, 6 }
  0xb9   : > { %v540_v48 = vpop.f32.mrf.mxu0 }
  0xba   : > { %v599_v49 = vpop.f32.mrf.mxu2  ;;  %v541_v52 = vadd.f32 %v540_v48, %v513_v46  ;;  %v674_v31 = vsel %vm671_vm1, %v672_v27, %v673_v22 }
  0xbb   : > { %v625_v54 = vpop.f32.mrf.mxu3  ;;  %v680_v37 = vadd.f32 %v674_v31, %v655_v34 }
  0xbc   : > { %v570_v56 = vadd.f32 %v569_v47, %v541_v52 }
  0xbd   : > { %v688_v42 = vadd.f32 %v684_v40, %v680_v37 }
  0xbe   : > { %v600_v61 = vadd.f32 %v599_v49, %v570_v56 }
  0xc0   : > { %v626_v3 = vadd.f32 %v625_v54, %v600_v61  ;;  %v575_v6 = vpop.f32.mrf.mxu1 }
  0xc1   : > { %v545_v5 = vpop.f32.mrf.mxu0 }
  0xc2   : > { %v546_v8 = vadd.f32 %v545_v5, %v517_v63  ;;  %v603_v11 = vpop.f32.mrf.mxu2  ;;  %v648_v16 = vmul.f32 %v646_v4, %v626_v3  ;;  %v664_v24 = vmul.f32 %v662_v14, %v626_v3  ;;  %v640_v30 = vmul.f32 %v638_v21, %v626_v3 }
  0xc3   : > { %v629_v17 = vpop.f32.mrf.mxu3 }
  0xc4   : > { %v576_v13 = vadd.f32 %v575_v6, %v546_v8  ;;  %v652_v26 = vrot.slane %v648_v16, 3  ;;  %v675_v32 = vrot.slane %v664_v24, 6 }
  0xc6   : > { %v604_v19 = vadd.f32 %v603_v11, %v576_v13  ;;  %v656_v35 = vadd.f32 %v652_v26, %v640_v30 }
  0xc8   : > { %v630_v23 = vadd.f32 %v629_v17, %v604_v19 }
  0xca   : > { %v666_v28 = vmul.f32 %v662_v14, %v630_v23  ;;  %v685_v39 = vrot.slane %v630_v23, 1 }
  0xcc   : > { %v676_v33 = vrot.slane %v666_v28, 6 }
  0xce   : > { %v677_v36 = vsel %vm671_vm1, %v675_v32, %v676_v33 }
  0xcf   : > { %v681_v38 = vadd.f32 %v677_v36, %v656_v35 }
  0xd1   : > { %v689_v41 = vadd.f32 %v685_v39, %v681_v38 }
  0xd3   : > { %v692_v43 = vrot.slane %v689_v41, 4 }
  0xd5   : > { %v694_v44 = vsel %vm693_vm2, %v688_v42, %v692_v43 }
  0xd6   : > { %696 = vst [vmem:[%s264_s29] sm:$0x77] %v694_v44 }
  0xd7 PF: > { %s13_s14 = sadd.s32 1, %s879_s14   ;;  %s952_s12 = smov %s875_s13 }
  0xd8   : > { %p10_p5 = scmp.ge.s32.totalorder %s13_s14, 4   ;;  %s953_s13 = smov %s955_s15 }
  0xda   :  { %12 = sbr.rel (!%p10_p5) target bundleno = 2 (0x2), region = 68 }

</bundles_post_ra>
